<compile_context>
chip_gen: v6e
topology: v6e:2x2x1
jax: 0.10.0
libtpu: 0.0.40
codegen_flags: <defaults>
</compile_context>

<pallas_src>
import math

import jax
import jax.numpy as jnp
from jax.experimental import pallas as pl
from jax.experimental.pallas import tpu as pltpu


# ----------------------------------------------------------------------------
# Fused kernel: pairwise MLP_L (layers 2..L) + max pool over the j-tile axis.
# ----------------------------------------------------------------------------
def _make_pair_mlp_pool_kernel(n_layers, ti, tj, m_valid, needs_mask):
    def kernel(ai_ref, aj_ref, *rest):
        o_ref, acc_ref = rest[-2], rest[-1]
        wbs = rest[:-2]

        I = pl.program_id(1)
        J = pl.program_id(2)
        nJ = pl.num_programs(2)

        ai = ai_ref[0].astype(jnp.float32)                   # (ti, H1)
        aj = aj_ref[0].astype(jnp.float32)                   # (tj, H1)

        # Layer-1 pairwise activations (bias already folded into A_j in the wrapper):
        #   h[i, j] = A_i[i] + A_j[j]  ==  Linear1(concat(x_j, x_i))
        h = ai[:, None, :] + aj[None, :, :]                  # (ti, tj, H1) f32
        h = h.reshape(ti * tj, h.shape[-1])                  # channels stay on the lane dim
        if n_layers > 1:
            h = jnp.maximum(h, 0.0)

        # Layers 2..L: bf16 MXU operands, f32 accumulation, f32 elementwise.
        for li in range(1, n_layers):
            w_ref = wbs[2 * (li - 1)]                        # bf16 (din, dout)
            b_ref = wbs[2 * (li - 1) + 1]                    # f32  (1, dout)
            h = jnp.dot(h.astype(jnp.bfloat16), w_ref[...],
                        preferred_element_type=jnp.float32) + b_ref[...]
            if li < n_layers - 1:
                h = jnp.maximum(h, 0.0)

        if needs_mask:
            # Tail tiles: knock padded (i, j) pairs out of the max (tj is a power of two here).
            r = jax.lax.broadcasted_iota(jnp.int32, (ti * tj, 1), 0)
            shift = tj.bit_length() - 1
            gi = I * ti + (r >> shift)
            gj = J * tj + (r & (tj - 1))
            h = jnp.where(jnp.logical_and(gi < m_valid, gj < m_valid), h, -jnp.inf)

        blk = jnp.max(h, axis=0, keepdims=True)              # (1, C)
        C = blk.shape[-1]

        # Accumulate the per-(bd, I) running max in VMEM scratch; write output once.
        @pl.when(J == 0)
        def _():
            acc_ref[...] = blk

        @pl.when(J > 0)
        def _():
            acc_ref[...] = jnp.maximum(acc_ref[...], blk)

        @pl.when(J == nJ - 1)
        def _():
            # Output block is (1, 8, C) (sublane-aligned); replicate the row 8x.
            o_ref[0] = jnp.broadcast_to(acc_ref[...], (8, C)).astype(o_ref.dtype)

    return kernel


# ----------------------------------------------------------------------------
# VMEM accounting & tile selection.
# ----------------------------------------------------------------------------
def _pair_step_bytes(t, l_widths):
    """Rough per-grid-step VMEM peak of the pairwise kernel at tile t x t."""
    f32 = 4
    # layer-1 (t, t, H1) broadcast result + its flattened copy
    peak = 2 * t * t * l_widths[0] * f32
    # worst adjacent layer pair around a dot: f32 input + bf16 cast + f32 output
    for a, b in zip(l_widths[:-1], l_widths[1:]):
        peak = max(peak, t * t * (6 * a + 4 * b))
    # double-buffered (t, H1) A_i / A_j activation tiles
    peak += 2 * 2 * t * l_widths[0] * f32
    return peak


def _vmem_budget_and_limit():
    """Generation-aware budget (v5e/v6e: 128 MiB VMEM, v7x: 64 MiB)."""
    cap = 64 << 20                                  # conservative default == v7x per-core VMEM
    try:
        info = pltpu.get_tpu_info()
        cap = int(getattr(info, "vmem_capacity_bytes", cap) or cap)
    except Exception:
        pass
    limit = min((cap * 3) // 4, 96 << 20)           # scoped-VMEM limit we request from Mosaic
    budget = (limit * 3) // 5                       # what tiles are sized against (headroom)
    return budget, limit


def _pick_pair_tile(m, l_widths, budget_bytes, max_tile=256):
    """Largest power-of-two tile in [8, max_tile] fitting the budget.

    Returns (tile, m_pad, needs_mask).  When tile < m the wrapper pads the point axis
    to m_pad and the kernel masks padded pairs, so any m works at the optimal tile.
    """
    t = 1 << max(3, min(256, int(max_tile)).bit_length() - 1)
    while t > 8 and _pair_step_bytes(t, l_widths) > budget_bytes:
        t //= 2
    if m <= t:
        return m, m, False                           # full axis: always a legal block
    m_pad = pl.cdiv(m, t) * t
    return t, m_pad, True


# ----------------------------------------------------------------------------
# pallas_call builder for the pairwise kernel.
# ----------------------------------------------------------------------------
def _pair_call(A_i, A_j, extra_wb, *, n_L, ti, tj, m, needs_mask, H1, C,
               dB, nI, nJ, vmem_limit, single_buffer_weights):
    const_kw = {"pipeline_mode": pl.Buffered(1)} if single_buffer_weights else {}
    in_specs = [
        pl.BlockSpec((1, ti, H1), lambda bd, I, J: (bd, I, 0)),   # A_i tile
        pl.BlockSpec((1, tj, H1), lambda bd, I, J: (bd, J, 0)),   # A_j tile
    ]
    for arr in extra_wb:                                          # constant weights / biases
        in_specs.append(pl.BlockSpec(arr.shape, lambda bd, I, J: (0, 0), **const_kw))

    return pl.pallas_call(
        _make_pair_mlp_pool_kernel(n_L, ti, tj, m, needs_mask),
        out_shape=jax.ShapeDtypeStruct((dB, nI * 8, C), jnp.float32),
        grid_spec=pltpu.PrefetchScalarGridSpec(
            num_scalar_prefetch=0,
            grid=(dB, nI, nJ),
            in_specs=in_specs,
            out_specs=pl.BlockSpec((1, 8, C), lambda bd, I, J: (bd, I, 0)),
            scratch_shapes=[pltpu.VMEM((1, C), jnp.float32)],
        ),
        compiler_params=pltpu.CompilerParams(
            # batch*chunk AND i-tile axes are parallel (feeds both v7x TensorCores even
            # when d*B is tiny); the j reduction axis is last and arbitrary.
            dimension_semantics=("parallel", "parallel", "arbitrary"),
            vmem_limit_bytes=int(vmem_limit),
        ),
    )(A_i, A_j, *extra_wb)


# ----------------------------------------------------------------------------
# Wrapper: full BoostedPointPairNet forward.
#   L_params / F_params: lists of (W, b); W already transposed to (din, dout), b is (1, dout).
# ----------------------------------------------------------------------------
def boosted_point_pair_net(X, L_params, F_params, d, *, max_pool=True, max_pair_tile=256):
    B, N, K = X.shape
    assert N % d == 0, "kernel requires an even chunk split (N % d == 0)"
    m = N // d
    assert L_params[0][0].shape[0] == 2 * K, "dims[0] must equal 2*K"
    assert L_params[-1][0].shape[1] == F_params[0][0].shape[0]

    H1 = L_params[0][0].shape[1]
    C = L_params[-1][0].shape[1]
    n_L = len(L_params)
    l_widths = [w.shape[1] for (w, _) in L_params]

    # --- plain-XLA prologue: chunk layout + hoisted MLP_L layer 1 -------------------
    # chunk-major (d*B, m, K); chunk c of torch.chunk holds points [c*m, (c+1)*m).
    Xc = jnp.transpose(X.reshape(B, d, m, K), (1, 0, 2, 3)).reshape(d * B, m, K)
    Xc = Xc.astype(jnp.float32)
    W1, b1 = L_params[0]
    # pair features are [x_j | x_i]  =>  W1[:K] multiplies x_j, W1[K:] multiplies x_i
    A_i = Xc @ W1[K:].astype(jnp.float32)                          # (d*B, m, H1)
    A_j = Xc @ W1[:K].astype(jnp.float32) + b1.astype(jnp.float32)  # bias folded once

    # bf16 weights / f32 biases for layers 2..L (count 2 buffers in case Buffered(1) is unused)
    extra_wb, wb_bytes = [], 0
    for (W, bvec) in L_params[1:]:
        extra_wb += [W.astype(jnp.bfloat16), bvec.astype(jnp.float32)]
        wb_bytes += W.size * 2 + bvec.size * 4

    budget, vmem_limit = _vmem_budget_and_limit()
    tile_budget = max(budget - 2 * wb_bytes, 1 << 20)
    t, m_pad, needs_mask = _pick_pair_tile(m, l_widths, tile_budget, max_tile=max_pair_tile)
    if m_pad != m:
        A_i = jnp.pad(A_i, ((0, 0), (0, m_pad - m), (0, 0)))
        A_j = jnp.pad(A_j, ((0, 0), (0, m_pad - m), (0, 0)))

    dB, nI, nJ = d * B, m_pad // t, m_pad // t
    call_kwargs = dict(n_L=n_L, ti=t, tj=t, m=m, needs_mask=needs_mask, H1=H1, C=C,
                       dB=dB, nI=nI, nJ=nJ, vmem_limit=vmem_limit)
    try:
        P_part = _pair_call(A_i, A_j, extra_wb, single_buffer_weights=True, **call_kwargs)
    except Exception:
        # Fallback if this Pallas build rejects single-buffered (Buffered(1)) operands.
        P_part = _pair_call(A_i, A_j, extra_wb, single_buffer_weights=False, **call_kwargs)

    # --- plain-XLA epilogue: fold i-tiles, MLP_F, boost pool (tiny work) ------------
    P = jnp.max(P_part, axis=1).reshape(d, B, C)                   # AdaptiveMaxPool2d((1,1))
    g = P
    for li, (W, bvec) in enumerate(F_params):
        g = jnp.dot(g, W.astype(jnp.float32)) + bvec.astype(jnp.float32)
        if li < len(F_params) - 1:
            g = jnp.maximum(g, 0.0)
    Y = jnp.max(g, axis=0) if max_pool else jnp.mean(g, axis=0)    # BoostPool (f32 accumulate)
    return Y.astype(X.dtype)


# ----------------------------------------------------------------------------
# Weight init mirroring the PyTorch module (xavier_uniform, relu gain, zero bias).
# ----------------------------------------------------------------------------
def init_mlp(key, dims):
    params = []
    gain = math.sqrt(2.0)  # nn.init.calculate_gain('relu')
    for i in range(1, len(dims)):
        key, sub = jax.random.split(key)
        din, dout = dims[i - 1], dims[i]
        bound = gain * math.sqrt(6.0 / (din + dout))
        W = jax.random.uniform(sub, (din, dout), jnp.float32, -bound, bound)
        b = jnp.zeros((1, dout), jnp.float32)
        params.append((W, b))
    return key, params


# ----------------------------------------------------------------------------
# Pure-JAX reference (mirrors the PyTorch forward exactly, all f32).
# ----------------------------------------------------------------------------
def ref_boosted_point_pair_net(X, L_params, F_params, d, *, max_pool=True):
    B, N, K = X.shape
    m = N // d
    Xck = X.reshape(B, d, m, K)
    Ys = []
    for c in range(d):
        Xi = Xck[:, c]                                            # (B, m, K)
        Xr = jnp.broadcast_to(Xi[:, None, :, :], (B, m, m, K))    # Xr[b,i,j] = Xi[b,j]
        Xrc = jnp.concatenate([Xr, jnp.swapaxes(Xr, 1, 2)], axis=-1)
        h = Xrc
        for li, (W, b) in enumerate(L_params):
            h = h @ W + b
            if li < len(L_params) - 1:
                h = jnp.maximum(h, 0.0)
        Pc = jnp.max(h, axis=(1, 2))                              # AdaptiveMaxPool2d((1,1))
        g = Pc
        for li, (W, b) in enumerate(F_params):
            g = g @ W + b
            if li < len(F_params) - 1:
                g = jnp.maximum(g, 0.0)
        Ys.append(g)
    Y = jnp.stack(Ys, axis=-1)                                    # (B, Fout, d)
    return jnp.max(Y, axis=-1) if max_pool else jnp.mean(Y, axis=-1)


if __name__ == "__main__":
    key = jax.random.PRNGKey(0)

    # Shapes consistent with the module: B=2, N=16 points, K=4 features, d=2 chunks,
    # MLP_L dims [2K, 32, 64], MLP_F dims [64, 32, 16].
    B, N, K, d = 2, 16, 4, 2
    dims = [2 * K, 32, 64]
    FC_dims = [64, 32, 16]

    key, kx = jax.random.split(key)
    X = jax.random.normal(kx, (B, N, K), dtype=jnp.float32)
    key, L_params = init_mlp(key, dims)
    key, F_params = init_mlp(key, FC_dims)

    # Config 1: max boost pool, tile == m (no masking path).
    Y = boosted_point_pair_net(X, L_params, F_params, d, max_pool=True)
    Y = jax.block_until_ready(Y)
    Y_ref = ref_boosted_point_pair_net(X, L_params, F_params, d, max_pool=True)
    assert Y.shape == (B, FC_dims[-1])
    assert jnp.allclose(Y, Y_ref, atol=3e-2, rtol=3e-2), float(jnp.max(jnp.abs(Y - Y_ref)))

    # Config 2: mean boost pool + point count that forces tail masking (m=20, tile=8).
    B2, N2, d2 = 2, 40, 2
    key, kx2 = jax.random.split(key)
    X2 = jax.random.normal(kx2, (B2, N2, K), dtype=jnp.float32)
    Y2 = boosted_point_pair_net(X2, L_params, F_params, d2, max_pool=False, max_pair_tile=8)
    Y2 = jax.block_until_ready(Y2)
    Y2_ref = ref_boosted_point_pair_net(X2, L_params, F_params, d2, max_pool=False)
    assert jnp.allclose(Y2, Y2_ref, atol=3e-2, rtol=3e-2), float(jnp.max(jnp.abs(Y2 - Y2_ref)))

    print("KERNEL_OK")
</pallas_src>

<mosaic_0001>
module attributes {stable_mosaic.version = 11 : i64} {
  func.func @kernel(%arg0: i32, %arg1: i32, %arg2: i32, %arg3: memref<1x8x32xf32, #tpu.memory_space<vmem>>, %arg4: memref<1x8x32xf32, #tpu.memory_space<vmem>>, %arg5: memref<32x64xbf16, #tpu.memory_space<vmem>>, %arg6: memref<1x64xf32, #tpu.memory_space<vmem>>, %arg7: memref<1x8x64xf32, #tpu.memory_space<vmem>>, %arg8: memref<1x64xf32, #tpu.memory_space<vmem>>) attributes {dimension_semantics = [#tpu.dimension_semantics<parallel>, #tpu.dimension_semantics<parallel>, #tpu.dimension_semantics<arbitrary>], iteration_bounds = array<i64: 4, 1, 1>, scalar_prefetch = 0 : i64, scratch_operands = 1 : i64, tpu.core_type = #tpu.core_type<tc>, window_params = [{transform_indices = @transform_0, window_bounds = array<i64: 1, 8, 32>}, {transform_indices = @transform_1, window_bounds = array<i64: 1, 8, 32>}, {pipeline_mode = #tpu.pipeline_mode<synchronous>, transform_indices = @transform_2, window_bounds = array<i64: 32, 64>}, {pipeline_mode = #tpu.pipeline_mode<synchronous>, transform_indices = @transform_3, window_bounds = array<i64: 1, 64>}, {transform_indices = @transform_4, window_bounds = array<i64: 1, 8, 64>}]} {
    %c0 = arith.constant 0 : index
    %c0_0 = arith.constant 0 : index
    %c0_1 = arith.constant 0 : index
    %0 = vector.load %arg3[%c0, %c0_0, %c0_1] : memref<1x8x32xf32, #tpu.memory_space<vmem>>, vector<1x8x32xf32>
    %1 = vector.shape_cast %0 : vector<1x8x32xf32> to vector<8x32xf32>
    %c0_2 = arith.constant 0 : index
    %c0_3 = arith.constant 0 : index
    %c0_4 = arith.constant 0 : index
    %2 = vector.load %arg4[%c0_2, %c0_3, %c0_4] : memref<1x8x32xf32, #tpu.memory_space<vmem>>, vector<1x8x32xf32>
    %3 = vector.shape_cast %2 : vector<1x8x32xf32> to vector<8x32xf32>
    %4 = vector.shape_cast %1 : vector<8x32xf32> to vector<8x1x32xf32>
    %5 = vector.shape_cast %3 : vector<8x32xf32> to vector<1x8x32xf32>
    %6 = vector.broadcast %4 : vector<8x1x32xf32> to vector<8x8x32xf32>
    %7 = vector.broadcast %5 : vector<1x8x32xf32> to vector<8x8x32xf32>
    %8 = arith.addf %6, %7 : vector<8x8x32xf32>
    %9 = vector.shape_cast %8 : vector<8x8x32xf32> to vector<64x32xf32>
    %cst = arith.constant 0.000000e+00 : f32
    %10 = vector.broadcast %cst : f32 to vector<64x32xf32>
    %11 = arith.maximumf %9, %10 : vector<64x32xf32>
    %12 = arith.truncf %11 : vector<64x32xf32> to vector<64x32xbf16>
    %c0_5 = arith.constant 0 : index
    %c0_6 = arith.constant 0 : index
    %13 = vector.load %arg5[%c0_5, %c0_6] : memref<32x64xbf16, #tpu.memory_space<vmem>>, vector<32x64xbf16>
    %cst_7 = arith.constant dense<0.000000e+00> : vector<64x64xf32>
    %14 = tpu.matmul %12, %13, %cst_7 {dimension_numbers = #tpu.dot_dimension_numbers<[1], [0], [0], [1], [0, 0, 1, 1], [], []>} : vector<64x32xbf16>, vector<32x64xbf16>, vector<64x64xf32> -> vector<64x64xf32>
    %c0_8 = arith.constant 0 : index
    %c0_9 = arith.constant 0 : index
    %15 = vector.load %arg6[%c0_8, %c0_9] : memref<1x64xf32, #tpu.memory_space<vmem>>, vector<1x64xf32>
    %16 = vector.broadcast %15 : vector<1x64xf32> to vector<64x64xf32>
    %17 = arith.addf %14, %16 : vector<64x64xf32>
    %cst_10 = arith.constant dense<0xFF800000> : vector<64xf32>
    %18 = vector.multi_reduction <maximumf>, %17, %cst_10 [0] : vector<64x64xf32> to vector<64xf32>
    %19 = vector.shape_cast %18 : vector<64xf32> to vector<1x64xf32>
    %c0_i32 = arith.constant 0 : i32
    %20 = arith.cmpi eq, %arg2, %c0_i32 : i32
    %21 = arith.extui %20 : i1 to i32
    %c0_i32_11 = arith.constant 0 : i32
    %22 = arith.cmpi ne, %21, %c0_i32_11 : i32
    scf.if %22 {
      %c0_16 = arith.constant 0 : index
      %c0_17 = arith.constant 0 : index
      %29 = vector.load %arg8[%c0_16, %c0_17] : memref<1x64xf32, #tpu.memory_space<vmem>>, vector<1x64xf32>
      tpu.vector_store %arg8[%c0_16, %c0_17], %19 {strides = array<i32>} : memref<1x64xf32, #tpu.memory_space<vmem>>, vector<1x64xf32>,
    } else {
    }
    %c0_i32_12 = arith.constant 0 : i32
    %23 = arith.cmpi sgt, %arg2, %c0_i32_12 : i32
    %24 = arith.extui %23 : i1 to i32
    %c0_i32_13 = arith.constant 0 : i32
    %25 = arith.cmpi ne, %24, %c0_i32_13 : i32
    scf.if %25 {
      %c0_16 = arith.constant 0 : index
      %c0_17 = arith.constant 0 : index
      %29 = vector.load %arg8[%c0_16, %c0_17] : memref<1x64xf32, #tpu.memory_space<vmem>>, vector<1x64xf32>
      %30 = arith.maximumf %29, %19 : vector<1x64xf32>
      %c0_18 = arith.constant 0 : index
      %c0_19 = arith.constant 0 : index
      %31 = vector.load %arg8[%c0_18, %c0_19] : memref<1x64xf32, #tpu.memory_space<vmem>>, vector<1x64xf32>
      tpu.vector_store %arg8[%c0_18, %c0_19], %30 {strides = array<i32>} : memref<1x64xf32, #tpu.memory_space<vmem>>, vector<1x64xf32>,
    } else {
    }
    %c0_i32_14 = arith.constant 0 : i32
    %26 = arith.cmpi eq, %arg2, %c0_i32_14 : i32
    %27 = arith.extui %26 : i1 to i32
    %c0_i32_15 = arith.constant 0 : i32
    %28 = arith.cmpi ne, %27, %c0_i32_15 : i32
    scf.if %28 {
      %c0_16 = arith.constant 0 : index
      %c0_17 = arith.constant 0 : index
      %29 = vector.load %arg8[%c0_16, %c0_17] : memref<1x64xf32, #tpu.memory_space<vmem>>, vector<1x64xf32>
      %30 = vector.shape_cast %29 : vector<1x64xf32> to vector<1x64xf32>
      %31 = vector.broadcast %30 : vector<1x64xf32> to vector<8x64xf32>
      %c0_18 = arith.constant 0 : index
      %c0_19 = arith.constant 0 : index
      %c0_20 = arith.constant 0 : index
      %32 = vector.load %arg7[%c0_18, %c0_19, %c0_20] : memref<1x8x64xf32, #tpu.memory_space<vmem>>, vector<1x8x64xf32>
      %33 = vector.shape_cast %32 : vector<1x8x64xf32> to vector<8x64xf32>
      %34 = vector.shape_cast %31 : vector<8x64xf32> to vector<1x8x64xf32>
      tpu.vector_store %arg7[%c0_18, %c0_19, %c0_20], %34 {strides = array<i32>} : memref<1x8x64xf32, #tpu.memory_space<vmem>>, vector<1x8x64xf32>,
    } else {
    }
    return
  }
  func.func @transform_0(%arg0: i32, %arg1: i32, %arg2: i32) -> (i32, i32, i32) {
    %c0_i32 = arith.constant 0 : i32
    %c0_i32_0 = arith.constant 0 : i32
    return %arg0, %arg1, %c0_i32 : i32, i32, i32
  }
  func.func @transform_1(%arg0: i32, %arg1: i32, %arg2: i32) -> (i32, i32, i32) {
    %c0_i32 = arith.constant 0 : i32
    %c0_i32_0 = arith.constant 0 : i32
    return %arg0, %arg2, %c0_i32 : i32, i32, i32
  }
  func.func @transform_2(%arg0: i32, %arg1: i32, %arg2: i32) -> (i32, i32) {
    %c0_i32 = arith.constant 0 : i32
    %c0_i32_0 = arith.constant 0 : i32
    %c0_i32_1 = arith.constant 0 : i32
    return %c0_i32, %c0_i32_0 : i32, i32
  }
  func.func @transform_3(%arg0: i32, %arg1: i32, %arg2: i32) -> (i32, i32) {
    %c0_i32 = arith.constant 0 : i32
    %c0_i32_0 = arith.constant 0 : i32
    %c0_i32_1 = arith.constant 0 : i32
    return %c0_i32, %c0_i32_0 : i32, i32
  }
  func.func @transform_4(%arg0: i32, %arg1: i32, %arg2: i32) -> (i32, i32, i32) {
    %c0_i32 = arith.constant 0 : i32
    %c0_i32_0 = arith.constant 0 : i32
    return %arg0, %arg1, %c0_i32 : i32, i32, i32
  }
}

module attributes {stable_mosaic.version = 11 : i64} {
  func.func @kernel(%arg0: i32, %arg1: i32, %arg2: i32, %arg3: memref<1x8x32xf32, #tpu.memory_space<vmem>>, %arg4: memref<1x8x32xf32, #tpu.memory_space<vmem>>, %arg5: memref<32x64xbf16, #tpu.memory_space<vmem>>, %arg6: memref<1x64xf32, #tpu.memory_space<vmem>>, %arg7: memref<1x8x64xf32, #tpu.memory_space<vmem>>, %arg8: memref<1x64xf32, #tpu.memory_space<vmem>>) attributes {dimension_semantics = [#tpu.dimension_semantics<parallel>, #tpu.dimension_semantics<parallel>, #tpu.dimension_semantics<arbitrary>], iteration_bounds = array<i64: 4, 1, 1>, scalar_prefetch = 0 : i64, scratch_operands = 1 : i64, tpu.core_type = #tpu.core_type<tc>, window_params = [{transform_indices = @transform_0, window_bounds = array<i64: 1, 8, 32>}, {transform_indices = @transform_1, window_bounds = array<i64: 1, 8, 32>}, {pipeline_mode = #tpu.pipeline_mode<synchronous>, transform_indices = @transform_2, window_bounds = array<i64: 32, 64>}, {pipeline_mode = #tpu.pipeline_mode<synchronous>, transform_indices = @transform_3, window_bounds = array<i64: 1, 64>}, {transform_indices = @transform_4, window_bounds = array<i64: 1, 8, 64>}]} {
    %c0 = arith.constant 0 : index
    %c0_0 = arith.constant 0 : index
    %c0_1 = arith.constant 0 : index
    %0 = vector.load %arg3[%c0, %c0_0, %c0_1] : memref<1x8x32xf32, #tpu.memory_space<vmem>>, vector<1x8x32xf32>
    %1 = vector.shape_cast %0 : vector<1x8x32xf32> to vector<8x32xf32>
    %c0_2 = arith.constant 0 : index
    %c0_3 = arith.constant 0 : index
    %c0_4 = arith.constant 0 : index
    %2 = vector.load %arg4[%c0_2, %c0_3, %c0_4] : memref<1x8x32xf32, #tpu.memory_space<vmem>>, vector<1x8x32xf32>
    %3 = vector.shape_cast %2 : vector<1x8x32xf32> to vector<8x32xf32>
    %4 = vector.shape_cast %1 : vector<8x32xf32> to vector<8x1x32xf32>
    %5 = vector.shape_cast %3 : vector<8x32xf32> to vector<1x8x32xf32>
    %6 = vector.broadcast %4 : vector<8x1x32xf32> to vector<8x8x32xf32>
    %7 = vector.broadcast %5 : vector<1x8x32xf32> to vector<8x8x32xf32>
    %8 = arith.addf %6, %7 : vector<8x8x32xf32>
    %9 = vector.shape_cast %8 : vector<8x8x32xf32> to vector<64x32xf32>
    %cst = arith.constant 0.000000e+00 : f32
    %10 = vector.broadcast %cst : f32 to vector<64x32xf32>
    %11 = arith.maximumf %9, %10 : vector<64x32xf32>
    %12 = arith.truncf %11 : vector<64x32xf32> to vector<64x32xbf16>
    %c0_5 = arith.constant 0 : index
    %c0_6 = arith.constant 0 : index
    %13 = vector.load %arg5[%c0_5, %c0_6] : memref<32x64xbf16, #tpu.memory_space<vmem>>, vector<32x64xbf16>
    %cst_7 = arith.constant dense<0.000000e+00> : vector<64x64xf32>
    %14 = tpu.matmul %12, %13, %cst_7 {dimension_numbers = #tpu.dot_dimension_numbers<[1], [0], [0], [1], [0, 0, 1, 1], [], []>} : vector<64x32xbf16>, vector<32x64xbf16>, vector<64x64xf32> -> vector<64x64xf32>
    %c0_8 = arith.constant 0 : index
    %c0_9 = arith.constant 0 : index
    %15 = vector.load %arg6[%c0_8, %c0_9] : memref<1x64xf32, #tpu.memory_space<vmem>>, vector<1x64xf32>
    %16 = vector.broadcast %15 : vector<1x64xf32> to vector<64x64xf32>
    %17 = arith.addf %14, %16 : vector<64x64xf32>
    %cst_10 = arith.constant dense<0xFF800000> : vector<64xf32>
    %18 = vector.multi_reduction <maximumf>, %17, %cst_10 [0] : vector<64x64xf32> to vector<64xf32>
    %19 = vector.shape_cast %18 : vector<64xf32> to vector<1x64xf32>
    %c0_i32 = arith.constant 0 : i32
    %20 = arith.cmpi eq, %arg2, %c0_i32 : i32
    %21 = arith.extui %20 : i1 to i32
    %c0_i32_11 = arith.constant 0 : i32
    %22 = arith.cmpi ne, %21, %c0_i32_11 : i32
    scf.if %22 {
      %c0_16 = arith.constant 0 : index
      %c0_17 = arith.constant 0 : index
      %29 = vector.load %arg8[%c0_16, %c0_17] : memref<1x64xf32, #tpu.memory_space<vmem>>, vector<1x64xf32>
      tpu.vector_store %arg8[%c0_16, %c0_17], %19 {strides = array<i32>} : memref<1x64xf32, #tpu.memory_space<vmem>>, vector<1x64xf32>,
    } else {
    }
    %c0_i32_12 = arith.constant 0 : i32
    %23 = arith.cmpi sgt, %arg2, %c0_i32_12 : i32
    %24 = arith.extui %23 : i1 to i32
    %c0_i32_13 = arith.constant 0 : i32
    %25 = arith.cmpi ne, %24, %c0_i32_13 : i32
    scf.if %25 {
      %c0_16 = arith.constant 0 : index
      %c0_17 = arith.constant 0 : index
      %29 = vector.load %arg8[%c0_16, %c0_17] : memref<1x64xf32, #tpu.memory_space<vmem>>, vector<1x64xf32>
      %30 = arith.maximumf %29, %19 : vector<1x64xf32>
      %c0_18 = arith.constant 0 : index
      %c0_19 = arith.constant 0 : index
      %31 = vector.load %arg8[%c0_18, %c0_19] : memref<1x64xf32, #tpu.memory_space<vmem>>, vector<1x64xf32>
      tpu.vector_store %arg8[%c0_18, %c0_19], %30 {strides = array<i32>} : memref<1x64xf32, #tpu.memory_space<vmem>>, vector<1x64xf32>,
    } else {
    }
    %c0_i32_14 = arith.constant 0 : i32
    %26 = arith.cmpi eq, %arg2, %c0_i32_14 : i32
    %27 = arith.extui %26 : i1 to i32
    %c0_i32_15 = arith.constant 0 : i32
    %28 = arith.cmpi ne, %27, %c0_i32_15 : i32
    scf.if %28 {
      %c0_16 = arith.constant 0 : index
      %c0_17 = arith.constant 0 : index
      %29 = vector.load %arg8[%c0_16, %c0_17] : memref<1x64xf32, #tpu.memory_space<vmem>>, vector<1x64xf32>
      %30 = vector.shape_cast %29 : vector<1x64xf32> to vector<1x64xf32>
      %31 = vector.broadcast %30 : vector<1x64xf32> to vector<8x64xf32>
      %c0_18 = arith.constant 0 : index
      %c0_19 = arith.constant 0 : index
      %c0_20 = arith.constant 0 : index
      %32 = vector.load %arg7[%c0_18, %c0_19, %c0_20] : memref<1x8x64xf32, #tpu.memory_space<vmem>>, vector<1x8x64xf32>
      %33 = vector.shape_cast %32 : vector<1x8x64xf32> to vector<8x64xf32>
      %34 = vector.shape_cast %31 : vector<8x64xf32> to vector<1x8x64xf32>
      tpu.vector_store %arg7[%c0_18, %c0_19, %c0_20], %34 {strides = array<i32>} : memref<1x8x64xf32, #tpu.memory_space<vmem>>, vector<1x8x64xf32>,
    } else {
    }
    return
  }
  func.func @transform_0(%arg0: i32, %arg1: i32, %arg2: i32) -> (i32, i32, i32) {
    %c0_i32 = arith.constant 0 : i32
    %c0_i32_0 = arith.constant 0 : i32
    return %arg0, %arg1, %c0_i32 : i32, i32, i32
  }
  func.func @transform_1(%arg0: i32, %arg1: i32, %arg2: i32) -> (i32, i32, i32) {
    %c0_i32 = arith.constant 0 : i32
    %c0_i32_0 = arith.constant 0 : i32
    return %arg0, %arg2, %c0_i32 : i32, i32, i32
  }
  func.func @transform_2(%arg0: i32, %arg1: i32, %arg2: i32) -> (i32, i32) {
    %c0_i32 = arith.constant 0 : i32
    %c0_i32_0 = arith.constant 0 : i32
    %c0_i32_1 = arith.constant 0 : i32
    return %c0_i32, %c0_i32_0 : i32, i32
  }
  func.func @transform_3(%arg0: i32, %arg1: i32, %arg2: i32) -> (i32, i32) {
    %c0_i32 = arith.constant 0 : i32
    %c0_i32_0 = arith.constant 0 : i32
    %c0_i32_1 = arith.constant 0 : i32
    return %c0_i32, %c0_i32_0 : i32, i32
  }
  func.func @transform_4(%arg0: i32, %arg1: i32, %arg2: i32) -> (i32, i32, i32) {
    %c0_i32 = arith.constant 0 : i32
    %c0_i32_0 = arith.constant 0 : i32
    return %arg0, %arg1, %c0_i32 : i32, i32, i32
  }
}

</mosaic_0001>

<bundles_post_ra>
// kernel: tpu_custom_call.1
= control target key start
LH: loop header
LB: loop body
LE: loop exit
PB: predicated region body
PF: predicated region fallthrough
CT: control target
= control target key end

     0   :  { %s1227_s0 = inlined_call_operand.hbm [shape: f32[4,8,32], index: 0, kind: input, shape index: {}]   ;;  %s1228_s1 = inlined_call_operand.hbm [shape: f32[4,8,32], index: 1, kind: input, shape index: {}]   ;;  %s1229_s2 = inlined_call_operand.hbm [shape: bf16[32,64], index: 2, kind: input, shape index: {}]   ;;  %s1230_s3 = inlined_call_operand.vmem [shape: f32[1,64], index: 3, kind: input, shape index: {}]   ;;  %s1231_s4 = inlined_call_operand.hbm [shape: f32[4,8,64], index: 4, kind: output, shape index: {}]  }
   0x1   :  { %1234 = sst [smem:[#allocation15_spill]] %s1229_s2 }
   0x2   :  { %9 = vsyncpa [#allocation4], 0 }
   0x3   :  { %11 = vsyncpa [#allocation4 + $0x1], 0 }
   0x4   :  { %12 = vsyncpa [#allocation7], 0 }
   0x5   :  { %14 = vsyncpa [#allocation7 + $0x1], 0 }
   0x6   :  { %15 = vsyncpa [#allocation5], 0 }
   0x7   :  { %17 = vsyncpa [#allocation5 + $0x1], 0  ;;  %s1019_s15 = smov 0   ;;  %s1021_s16 = smov 0  }
   0x8   :  { %s1023_s17 = smov 0   ;;  %s1025_s18 = smov 0  }
   0x9   :  { %s1027_s19 = smov 0   ;;  %s1029_s20 = smov 0  }
   0xa LB: > { %s1050_s21 = sadd.s32 4294967295, %s985_s20   ;;  %s684_s22 = sadd.s32 4294967294, %s985_s20   ;;  %s985_s20 = sphi %s1029_s20, %s23_s20   ;;  %s981_s19 = sphi %s1027_s19, %s1252_s19   ;;  %s977_s18 = sphi %s1025_s18, %s1251_s18   ;;  %s973_s17 = sphi %s1023_s17, %s1250_s17   ;;  %s969_s16 = sphi %s1021_s16, %s1249_s16   ;;  %s965_s15 = sphi %s1019_s15, %s1248_s15  }
   0xb   : > { %p64_p0 = scmp.ne.s32.totalorder %s969_s16, %s965_s15  ;;  %p1233_p1 = scmp.eq.s32.totalorder %s1050_s21, 0 }
   0xc   : > { %p166_p3 = scmp.eq.s32.totalorder %s684_s22, 3  ;;  %p685_p5 = scmp.ge.s32.totalorder %s985_s20, 1 }
   0xd   : > { %p1059_p4 = por %p1233_p1, %p64_p0  ;;  %p173_p7 = scmp.lt.s32.totalorder %s985_s20, 5 }
   0xe   : > { %p1064_p6 = por %p166_p3, %p64_p0  ;;  %s987_s26 = smov [#allocation8]  }
   0xf   : > { %p1069_p8 = pnand %p685_p5, %p173_p7  ;;  %s185_s27 = sshll.u32 %s987_s26, 4  ;;  %s186_s27 = int_to_ptr.vmem [resolvable:$true] %s185_s27 }
  0x10   : > { %s42_s29 = sadd.s32 1, %s981_s19  ;;  %s826_s30 = scalar_lea.vmem %s186_s27, 256 }
  0x11   : > { %p741_p9 = pneg %p1069_p8  ;;  %p827_p12 = scmp.ne.s32.totalorder %s186_s27, %s826_s30 }
  0x12   : > { %p834_p3 = scmp.lt.s32.totalorder %s186_s27, %s186_s27  ;;  %p835_p5 = scmp.lt.s32.totalorder %s826_s30, %s826_s30 }
  0x13   : > { %p1077_p10 = pnand %p741_p9, %p1233_p1 }
  0x14   : > { %p836_p7 = por %p835_p5, %p834_p3 }
  0x15   : > { %p817_p11 = pneg %p1077_p10 }
  0x17   : > { %p829_p13 = pnand %p827_p12, %p817_p11 }
  0x19   : > { %p830_p0 = pneg %p829_p13 }
  0x1b   : > { %p837_p2 = pnand %p836_p7, %p830_p0 }
  0x1d   : > { %840 = shalt.err (!%p837_p2)
}
  0x1e   : > { %s988_s5 = smov 64   ;;  %s989_s6 = smov 4  }
  0x1f   : > { %s1239_s2 = sld [smem:[#allocation15_spill]]  ;;  %p44_p9 = scmp.ge.s32.totalorder %s42_s29, 4 }
  0x20   : > { %s51_s9 = sadd.s32 1, %s973_s17  ;;  %p58_p2 = scmp.ne.s32.totalorder %s973_s17, %s969_s16 }
  0x21   : > { %p59_p11 = scmp.eq.s32.totalorder %s985_s20, 0  ;;  %s1254_s29 = smov (%p44_p9, %s42_s29), 0 }
  0x22   : > { %1240 = sst [smem:[#allocation14_spill]] %s1254_s29  ;;  %p1242_p13 = scmp.eq.s32.totalorder %s1050_s21, 3 }
  0x23   : > { %p1095_p12 = por %p59_p11, %p58_p2  ;;  %s46_s12 = ssub.s32 %s981_s19, %s1254_s29 }
  0x24   : > { %p1101_p0 = por %p1242_p13, %p58_p2  ;;  %p49_p3 = scmp.eq.s32.totalorder %s46_s12, 0 }
  0x25   : > { %744 = dma.hbm_to_vmem [thread:$0]  (!%p1077_p10), %s1239_s2, 256, %s186_s27, [#allocation7], %s988_s5, %s988_s5, %s989_s6  }
  0x26   : > { %p757_p10 = scmp.lt.s32.totalorder %s985_s20, 4  ;;  %s202_s13 = sand.u32 1, %s973_s17  }
  0x27   : > { %s688_s14 = sshll.u32 %s202_s13, 3  ;;  %s689_s26 = sshll.u32 %s981_s19, 7 }
  0x28   : > { %s1110_s22 = scalar_select %p49_p3, %s973_s17, %s51_s9  }
  0x29   : > { %s212_s30 = scalar_lea.hbm %s1227_s0, %s689_s26  ;;  %s206_s5 = scalar_lea.vmem [#allocation3], %s688_s14 }
  0x2a   : > { %s214_s6 = sshll.u32 %s206_s5, 4  ;;  %p1118_p5 = pnand %p757_p10, %p1095_p12  ;;  %s215_s6 = int_to_ptr.vmem [resolvable:$true] %s214_s6 }
  0x2b   : > { %s1125_s9 = scalar_lea.hbm %s1228_s1, %s689_s26  ;;  %s221_s12 = sand.u32 1, %s985_s20  }
  0x2c   : > { %s203_s29 = scalar_lea.sflag [#allocation4], %s202_s13  ;;  %p843_p7 = pneg %p1118_p5 }
  0x2d   : > { %s854_s27 = scalar_lea.vmem %s215_s6, 128  ;;  %s990_s10 = smov [#allocation3]  }
  0x2e   : > { %p855_p9 = scmp.ne.s32.totalorder %s215_s6, %s854_s27  ;;  %s859_s28 = sshll.u32 %s990_s10, 4  ;;  %s860_s28 = int_to_ptr.vmem [resolvable:$false] %s859_s28 }
  0x2f   : > { %s861_s5 = scalar_lea.vmem %s860_s28, 256  ;;  %p862_p12 = scmp.lt.s32.totalorder %s215_s6, %s860_s28 }
  0x30   : > { %p857_p2 = pnand %p855_p9, %p843_p7  ;;  %p863_p13 = scmp.lt.s32.totalorder %s861_s5, %s854_s27 }
  0x32   : > { %p858_p11 = pneg %p857_p2  ;;  %p864_p10 = por %p863_p13, %p862_p12 }
  0x34   : > { %p865_p3 = pnand %p864_p10, %p858_p11 }
  0x36   : > { %868 = shalt.err (!%p865_p3)
}
  0x37   : > { %748 = dma.hbm_to_vmem [thread:$0]  (!%p1118_p5), %s212_s30, 128, %s215_s6, %s203_s29  }
  0x38   : > { %s225_s2 = scalar_lea.vmem [#allocation6], %s688_s14  ;;  %s222_s26 = scalar_lea.sflag [#allocation7], %s221_s12 }
  0x39   : > { %s233_s13 = sshll.u32 %s225_s2, 4  ;;  %s991_s10 = smov [#allocation6]   ;;  %s234_s13 = int_to_ptr.vmem [resolvable:$true] %s233_s13 }
  0x3a   : > { %s882_s8 = scalar_lea.vmem %s234_s13, 128  ;;  %s887_s28 = sshll.u32 %s991_s10, 4  ;;  %s888_s28 = int_to_ptr.vmem [resolvable:$false] %s887_s28 }
  0x3b   : > { %p883_p9 = scmp.ne.s32.totalorder %s234_s13, %s882_s8  ;;  %s889_s27 = scalar_lea.vmem %s888_s28, 256 }
  0x3c   : > { %p890_p11 = scmp.lt.s32.totalorder %s234_s13, %s888_s28  ;;  %p891_p12 = scmp.lt.s32.totalorder %s889_s27, %s882_s8 }
  0x3d   : > { %p885_p2 = pnand %p883_p9, %p843_p7 }
  0x3e   : > { %p892_p13 = por %p891_p12, %p890_p11 }
  0x3f   : > { %p886_p1 = pneg %p885_p2 }
  0x41   : > { %p893_p10 = pnand %p892_p13, %p886_p1 }
  0x43   : > { %896 = shalt.err (!%p893_p10)
}
  0x44   : > { %751 = dma.hbm_to_vmem [thread:$0]  (!%p1118_p5), %s1125_s9, 128, %s234_s13, %s222_s26  }
  0x45   : > { %242 = sbr.rel (%p1069_p8) target bundleno = 346 (0x15a), region = 36  ;;  %s1144_s29 = sand.u32 (!%p1069_p8), 1, %s969_s16  }
  0x46   : > { %s1147_s14 = sshll.u32 (!%p1069_p8), %s1144_s29, 3  ;;  %s245_s30 = scalar_lea.sflag (!%p1069_p8), [#allocation4], %s1144_s29 }
  0x47   : > { %s248_s6 = scalar_lea.vmem (!%p1069_p8), [#allocation3], %s1147_s14 }
  0x4a   : > { %948 = dma.done.wait (%p1059_p4), %s245_s30, 128  }
  0x4b   : > { %950 = vsyncadd (%p1059_p4), %s245_s30, 4294967168  ;;  %s253_s25 = sand.u32 1, %s1050_s21   ;;  %s257_s9 = scalar_lea.vmem [#allocation6], %s1147_s14 }
  0x4c   : > { %s254_s7 = scalar_lea.sflag [#allocation7], %s253_s25 }
  0x4d   : > { %952 = dma.done.wait (%p1059_p4), %s254_s7, 128  }
  0x4e   : > { %954 = vsyncadd (%p1059_p4), %s254_s7, 4294967168  ;;  %p1245_p1 = scmp.eq.s32.totalorder %s1050_s21, 0 }
  0x50   : > { %956 = dma.done.wait (%p1245_p1), [#allocation7], 256   ;;  %p1246_p8 = pmov %p1245_p1 }
  0x51   : > { %v299_v0 = vlaneseq  ;;  %v992_v1 = vmov 1966171168   ;;  %v812_v6 = vld [vmem:[#allocation8 + $0x8] sm:$0xff]   ;;  %v813_v7 = vld [vmem:[#allocation8] sm:$0xff]   ;;  %v293_v15 = vld [vmem:[%s257_s9] sm:$0xff]  ;;  %vm427_vm0 = vcmask 261120  }
  0x52   : > { %958 = vsyncadd (%p1246_p8), [#allocation7], 4294967040  ;;  %v297_v2 = vunpack.c.l.s4 %v992_v1  ;;  %715 = vmatprep.subr.bf16.mxu0 %v812_v6  ;;  %727 = vmatprep.subr.bf16.mxu1 %v812_v6  ;;  %v292_v8 = vld [vmem:[%s248_s6] sm:$0xff]  ;;  %v697_v53 = vld [vmem:[%s1230_s3] ss:$0 sm:$0xff]  ;;  %vm505_vm1 = vcmask 523264  }
  0x53   : > { %v300_v3 = vshrl.u32 %v299_v0, 7  ;;  %716 = vmatpush3.bf16.msra.mxu0 %v812_v6  ;;  %729 = vmatpush3.bf16.msra.mxu1 %v812_v6  ;;  %v295_v11 = vcombine.high %v292_v8, %v292_v8  ;;  %vm531_vm2 = vcmask 516096   ;;  %s706_s12 = sshll.u32 %s977_s18, 7  ;;  %s290_s5 = scalar_lea.vmem [#allocation9], %s1147_s14 }
  0x54   : > { %v298_v4 = vunpack.c.0.s8 %v297_v2  ;;  %717 = vmatprep.subr.bf16.mxu0 %v813_v7  ;;  %728 = vmatprep.subr.bf16.mxu1 %v813_v7  ;;  %s567_s2 = sshll.u32 %s290_s5, 4  ;;  %s1185_s8 = scalar_lea.hbm %s1231_s4, %s706_s12  ;;  %s568_s2 = int_to_ptr.vmem [resolvable:$true] %s567_s2 }
  0x55   : > { %v346_v10 = vsub.s32 0, %v300_v3  ;;  %s553_s10 = scalar_lea.sflag [#allocation5], %s1144_s29  ;;  %s897_s28 = scalar_lea.vmem %s568_s2, 128 }
  0x56   : > { %v301_v5 = vsub.s32 %v298_v4, %v300_v3  ;;  %p898_p4 = scmp.ne.s32.totalorder %s568_s2, %s897_s28  ;;  %s993_s27 = smov [#allocation9]  }
  0x57   : > { %718 = vmatpush3.bf16.msra.mxu0 %v813_v7  ;;  %730 = vmatpush3.bf16.msra.mxu1 %v813_v7  ;;  %s901_s30 = sshll.u32 %s993_s27, 4  ;;  %s902_s30 = int_to_ptr.vmem [resolvable:$false] %s901_s30 }
  0x58   : > { %v302_v9 = vrot.slane %v292_v8, %v301_v5  ;;  %v309_v14 = vrot.slane %v295_v11, %v301_v5  ;;  %p899_p5 = pnand %p898_p4, %p1101_p0  ;;  %s903_s18 = scalar_lea.vmem %s902_s30, 256 }
  0x59   : > { %p904_p3 = scmp.lt.s32.totalorder %s568_s2, %s902_s30  ;;  %p905_p9 = scmp.lt.s32.totalorder %s903_s18, %s897_s28 }
  0x5a   : > { %v310_v12 = vcombine.high %v302_v9, %v302_v9  ;;  %v318_v13 = vrot.slane %v302_v9, %v301_v5  ;;  %v311_v19 = vcombine.high %v309_v14, %v309_v14  ;;  %v325_v20 = vrot.slane %v309_v14, %v301_v5  ;;  %p900_p7 = pneg %p899_p5 }
  0x5b   : > { %p906_p2 = por %p905_p9, %p904_p3 }
  0x5c   : > { %v332_v16 = vrot.slane %v310_v12, %v301_v5  ;;  %v340_v17 = vcombine.high %v318_v13, %v318_v13  ;;  %v347_v18 = vrot.slane %v318_v13, %v346_v10  ;;  %v339_v25 = vrot.slane %v311_v19, %v301_v5 }
  0x5d   : > { %v341_v26 = vcombine.high %v325_v20, %v325_v20  ;;  %v363_v27 = vrot.slane %v325_v20, %v346_v10  ;;  %p907_p11 = pnand %p906_p2, %p900_p7 }
  0x5e   : > { %v342_v21 = vcombine.high %v332_v16, %v332_v16  ;;  %v351_v22 = vrot.slane %v332_v16, %v346_v10  ;;  %v384_v23 = vadd.f32 %v347_v18, %v293_v15  ;;  %v355_v24 = vrot.slane %v340_v17, %v346_v10 }
  0x5f   : > { %v343_v32 = vcombine.high %v339_v25, %v339_v25  ;;  %v367_v33 = vrot.slane %v339_v25, %v346_v10  ;;  %v388_v34 = vadd.f32 %v363_v27, %v293_v15  ;;  %v371_v35 = vrot.slane %v341_v26, %v346_v10 }
  0x60   : > { %v385_v28 = vadd.f32 %v351_v22, %v293_v15  ;;  %v392_v29 = vmax.f32 %v384_v23, 0.0  ;;  %v359_v30 = vrot.slane %v342_v21, %v346_v10  ;;  %v386_v31 = vadd.f32 %v355_v24, %v293_v15 }
  0x61   : > { %v389_v39 = vadd.f32 %v367_v33, %v293_v15  ;;  %v396_v40 = vmax.f32 %v388_v34, 0.0  ;;  %v375_v41 = vrot.slane %v343_v32, %v346_v10  ;;  %v390_v42 = vadd.f32 %v371_v35, %v293_v15 }
  0x62   : > { %v393_v36 = vmax.f32 %v385_v28, 0.0  ;;  %v387_v37 = vadd.f32 %v359_v30, %v293_v15  ;;  %v394_v38 = vmax.f32 %v386_v31, 0.0 }
  0x63   : > { %v397_v45 = vmax.f32 %v389_v39, 0.0  ;;  %v391_v46 = vadd.f32 %v375_v41, %v293_v15  ;;  %v398_v47 = vmax.f32 %v390_v42, 0.0 }
  0x64   : > { %v400_v43 = vpack.c.bf16 %v393_v36, %v392_v29  ;;  %v395_v44 = vmax.f32 %v387_v37, 0.0 }
  0x65   : > { %v402_v49 = vpack.c.bf16 %v397_v45, %v396_v40  ;;  %v399_v50 = vmax.f32 %v391_v46, 0.0 }
  0x66   : > { %719 = vmatprep.mubr.msk.bf16.mxu0 %vm427_vm0, %v400_v43  ;;  %v401_v48 = vpack.c.bf16 %v395_v44, %v394_v38 }
  0x67   : > { %723 = vmatprep.mubr.msk.bf16.mxu1 %vm427_vm0, %v402_v49  ;;  %v403_v51 = vpack.c.bf16 %v399_v50, %v398_v47 }
  0x68   : > { %720 = vmatmul.mubr.msk.bf16.vlgmr.msra.gmra.mxu0 %vm427_vm0, %v401_v48 }
  0x69   : > { %724 = vmatmul.mubr.msk.bf16.vlgmr.msra.gmra.mxu1 %vm427_vm0, %v403_v51 }
 0x128   : > { %v721_v52 = vpop.f32.mrf.mxu0 }
 0x129   : > { %v725_v55 = vpop.f32.mrf.mxu1  ;;  %v483_v57 = vadd.f32 %v721_v52, %v697_v53 }
 0x12a   : > { %v474_v54 = vpop.f32.mrf.mxu0  ;;  %v499_v58 = vadd.f32 %v725_v55, %v697_v53 }
 0x12b   : > { %v490_v59 = vpop.f32.mrf.mxu1  ;;  %v475_v0 = vadd.f32 %v697_v53, %v474_v54  ;;  %v508_v3 = vsel %vm505_vm1, %v483_v57, -inf }
 0x12c   : > { %v722_v56 = vpop.f32.mrf.mxu0  ;;  %v491_v61 = vadd.f32 %v697_v53, %v490_v59  ;;  %v514_v4 = vsel %vm505_vm1, %v499_v58, -inf }
 0x12d   : > { %v486_v60 = vadd.f32 %v722_v56, %v697_v53  ;;  %v726_v63 = vpop.f32.mrf.mxu1  ;;  %v506_v11 = vsel %vm505_vm1, %v475_v0, -inf  ;;  %v515_v14 = vmax.f32 %v508_v3, %v514_v4 }
 0x12e   : > { %v477_v62 = vpop.f32.mrf.mxu0  ;;  %v502_v2 = vadd.f32 %v726_v63, %v697_v53  ;;  %v510_v7 = vsel %vm505_vm1, %v491_v61, -inf }
 0x12f   : > { %v478_v1 = vadd.f32 %v697_v53, %v477_v62  ;;  %v493_v5 = vpop.f32.mrf.mxu1  ;;  %v509_v6 = vsel %vm505_vm1, %v486_v60, -inf  ;;  %v511_v15 = vmax.f32 %v506_v11, %v510_v7 }
 0x130   : > { %v516_v8 = vsel %vm505_vm1, %v502_v2, -inf  ;;  %v494_v9 = vadd.f32 %v697_v53, %v493_v5 }
 0x131   : > { %v517_v10 = vmax.f32 %v509_v6, %v516_v8  ;;  %v507_v12 = vsel %vm505_vm1, %v478_v1, -inf }
 0x132   : > { %v512_v13 = vsel %vm505_vm1, %v494_v9, -inf }
 0x133   : > { %v513_v16 = vmax.f32 %v507_v12, %v512_v13  ;;  %v519_v17 = vmax.f32 %v515_v14, %v517_v10 }
 0x135   : > { %v518_v18 = vmax.f32 %v511_v15, %v513_v16 }
 0x137   : > { %v520_v19 = vmax.f32 %v518_v18, %v519_v17 }
 0x139   : > { %v521_v20 = vrot.slane %v520_v19, 4 }
 0x13b   : > { %v522_v21 = vmax.f32 %v520_v19, %v521_v20 }
 0x13d   : > { %v523_v22 = vrot.slane %v522_v21, 2 }
 0x13f   : > { %v524_v23 = vmax.f32 %v522_v21, %v523_v22 }
 0x141   : > { %v525_v24 = vrot.slane %v524_v23, 1 }
 0x143   : > { %v526_v25 = vmax.f32 %v524_v23, %v525_v24 }
 0x145   : > { %532 = vst.msk [vmem:[#allocation2] sm:$0x1] %vm531_vm2, %v526_v25 }
 0x14c   : > { %v704_v26 = vld [vmem:[#allocation2] ss:$0 sm:$0xff] }
 0x14d   : > { %551 = vst.msk [vmem:[%s290_s5] sm:$0xff] %vm505_vm1, %v704_v26 }
 0x14e   : > { %910 = shalt.err (!%p907_p11)
}
 0x14f   : > { %s911_s14 = scalar_lea.hbm %s1185_s8, 128  ;;  %s915_s25 = scalar_lea.hbm %s1231_s4, 512 }
 0x150   : > { %p912_p12 = scmp.ne.s32.totalorder %s1185_s8, %s911_s14  ;;  %p916_p1 = scmp.lt.s32.totalorder %s1185_s8, %s1231_s4 }
 0x151   : > { %p917_p8 = scmp.lt.s32.totalorder %s915_s25, %s911_s14 }
 0x152   : > { %p913_p13 = pnand %p912_p12, %p1101_p0 }
 0x153   : > { %p918_p4 = por %p917_p8, %p916_p1 }
 0x154   : > { %p914_p10 = pneg %p913_p13 }
 0x156   : > { %p919_p5 = pnand %p918_p4, %p914_p10 }
 0x158   : > { %922 = shalt.err (!%p919_p5)
}
 0x159   : > { %739 = dma.vmem_to_hbm [thread:$0]  (%p1101_p0), %s568_s2, 128, %s1185_s8, %s553_s10  }
 0x15a PF: > { %p759_p7 = scmp.ge.s32.totalorder %s985_s20, 2  ;;  %s579_s21 = sand.u32 1, %s965_s15  }
 0x15b   : > { %s580_s23 = scalar_lea.sflag [#allocation5], %s579_s21 }
 0x15c   : > { %p753_p3 = pnand %p759_p7, %p1064_p6 }
 0x15e   : > { %p754_p9 = pneg %p753_p3 }
 0x160   : > { %960 = dma.done.wait (%p754_p9), %s580_s23, 128  }
 0x161   : > { %962 = vsyncadd (%p754_p9), %s580_s23, 4294967168  ;;  %s23_s20 = sadd.s32 1, %s985_s20   ;;  %s1247_s11 = sld [smem:[#allocation14_spill]] }
 0x162   : > { %p20_p2 = scmp.ge.s32.totalorder %s23_s20, 6   ;;  %s1248_s15 = smov %s969_s16 }
 0x163   : > { %s1249_s16 = smov %s973_s17  ;;  %s1250_s17 = smov %s1110_s22 }
 0x164   : > { %s1251_s18 = smov %s981_s19  ;;  %22 = sbr.rel (!%p20_p2) target bundleno = 10 (0xa), region = 110 }
 0x167   : > { %s1252_s19 = smov %s1247_s11 }
 0x169   :  { %585 = vsyncpa [#allocation4], 1 }
 0x16a   :  { %587 = vsyncpa [#allocation4 + $0x1], 1 }
 0x16b   :  { %588 = vsyncpa [#allocation7], 1 }
 0x16c   :  { %590 = vsyncpa [#allocation7 + $0x1], 1 }
 0x16d   :  { %591 = vsyncpa [#allocation5], 1 }
 0x16e   :  { %593 = vsyncpa [#allocation5 + $0x1], 1 }

// kernel: tpu_custom_call.1
= control target key start
LH: loop header
LB: loop body
LE: loop exit
PB: predicated region body
PF: predicated region fallthrough
CT: control target
= control target key end

     0   :  { %s1227_s0 = inlined_call_operand.hbm [shape: f32[4,8,32], index: 0, kind: input, shape index: {}]   ;;  %s1228_s1 = inlined_call_operand.hbm [shape: f32[4,8,32], index: 1, kind: input, shape index: {}]   ;;  %s1229_s2 = inlined_call_operand.hbm [shape: bf16[32,64], index: 2, kind: input, shape index: {}]   ;;  %s1230_s3 = inlined_call_operand.vmem [shape: f32[1,64], index: 3, kind: input, shape index: {}]   ;;  %s1231_s4 = inlined_call_operand.hbm [shape: f32[4,8,64], index: 4, kind: output, shape index: {}]  }
   0x1   :  { %1234 = sst [smem:[#allocation15_spill]] %s1229_s2 }
   0x2   :  { %9 = vsyncpa [#allocation4], 0 }
   0x3   :  { %11 = vsyncpa [#allocation4 + $0x1], 0 }
   0x4   :  { %12 = vsyncpa [#allocation7], 0 }
   0x5   :  { %14 = vsyncpa [#allocation7 + $0x1], 0 }
   0x6   :  { %15 = vsyncpa [#allocation5], 0 }
   0x7   :  { %17 = vsyncpa [#allocation5 + $0x1], 0  ;;  %s1019_s15 = smov 0   ;;  %s1021_s16 = smov 0  }
   0x8   :  { %s1023_s17 = smov 0   ;;  %s1025_s18 = smov 0  }
   0x9   :  { %s1027_s19 = smov 0   ;;  %s1029_s20 = smov 0  }
   0xa LB: > { %s1050_s21 = sadd.s32 4294967295, %s985_s20   ;;  %s684_s22 = sadd.s32 4294967294, %s985_s20   ;;  %s985_s20 = sphi %s1029_s20, %s23_s20   ;;  %s981_s19 = sphi %s1027_s19, %s1252_s19   ;;  %s977_s18 = sphi %s1025_s18, %s1251_s18   ;;  %s973_s17 = sphi %s1023_s17, %s1250_s17   ;;  %s969_s16 = sphi %s1021_s16, %s1249_s16   ;;  %s965_s15 = sphi %s1019_s15, %s1248_s15  }
   0xb   : > { %p64_p0 = scmp.ne.s32.totalorder %s969_s16, %s965_s15  ;;  %p1233_p1 = scmp.eq.s32.totalorder %s1050_s21, 0 }
   0xc   : > { %p166_p3 = scmp.eq.s32.totalorder %s684_s22, 3  ;;  %p685_p5 = scmp.ge.s32.totalorder %s985_s20, 1 }
   0xd   : > { %p1059_p4 = por %p1233_p1, %p64_p0  ;;  %p173_p7 = scmp.lt.s32.totalorder %s985_s20, 5 }
   0xe   : > { %p1064_p6 = por %p166_p3, %p64_p0  ;;  %s987_s26 = smov [#allocation8]  }
   0xf   : > { %p1069_p8 = pnand %p685_p5, %p173_p7  ;;  %s185_s27 = sshll.u32 %s987_s26, 4  ;;  %s186_s27 = int_to_ptr.vmem [resolvable:$true] %s185_s27 }
  0x10   : > { %s42_s29 = sadd.s32 1, %s981_s19  ;;  %s826_s30 = scalar_lea.vmem %s186_s27, 256 }
  0x11   : > { %p741_p9 = pneg %p1069_p8  ;;  %p827_p12 = scmp.ne.s32.totalorder %s186_s27, %s826_s30 }
  0x12   : > { %p834_p3 = scmp.lt.s32.totalorder %s186_s27, %s186_s27  ;;  %p835_p5 = scmp.lt.s32.totalorder %s826_s30, %s826_s30 }
  0x13   : > { %p1077_p10 = pnand %p741_p9, %p1233_p1 }
  0x14   : > { %p836_p7 = por %p835_p5, %p834_p3 }
  0x15   : > { %p817_p11 = pneg %p1077_p10 }
  0x17   : > { %p829_p13 = pnand %p827_p12, %p817_p11 }
  0x19   : > { %p830_p0 = pneg %p829_p13 }
  0x1b   : > { %p837_p2 = pnand %p836_p7, %p830_p0 }
  0x1d   : > { %840 = shalt.err (!%p837_p2)
}
  0x1e   : > { %s988_s5 = smov 64   ;;  %s989_s6 = smov 4  }
  0x1f   : > { %s1239_s2 = sld [smem:[#allocation15_spill]]  ;;  %p44_p9 = scmp.ge.s32.totalorder %s42_s29, 4 }
  0x20   : > { %s51_s9 = sadd.s32 1, %s973_s17  ;;  %p58_p2 = scmp.ne.s32.totalorder %s973_s17, %s969_s16 }
  0x21   : > { %p59_p11 = scmp.eq.s32.totalorder %s985_s20, 0  ;;  %s1254_s29 = smov (%p44_p9, %s42_s29), 0 }
  0x22   : > { %1240 = sst [smem:[#allocation14_spill]] %s1254_s29  ;;  %p1242_p13 = scmp.eq.s32.totalorder %s1050_s21, 3 }
  0x23   : > { %p1095_p12 = por %p59_p11, %p58_p2  ;;  %s46_s12 = ssub.s32 %s981_s19, %s1254_s29 }
  0x24   : > { %p1101_p0 = por %p1242_p13, %p58_p2  ;;  %p49_p3 = scmp.eq.s32.totalorder %s46_s12, 0 }
  0x25   : > { %744 = dma.hbm_to_vmem [thread:$0]  (!%p1077_p10), %s1239_s2, 256, %s186_s27, [#allocation7], %s988_s5, %s988_s5, %s989_s6  }
  0x26   : > { %p757_p10 = scmp.lt.s32.totalorder %s985_s20, 4  ;;  %s202_s13 = sand.u32 1, %s973_s17  }
  0x27   : > { %s688_s14 = sshll.u32 %s202_s13, 3  ;;  %s689_s26 = sshll.u32 %s981_s19, 7 }
  0x28   : > { %s1110_s22 = scalar_select %p49_p3, %s973_s17, %s51_s9  }
  0x29   : > { %s212_s30 = scalar_lea.hbm %s1227_s0, %s689_s26  ;;  %s206_s5 = scalar_lea.vmem [#allocation3], %s688_s14 }
  0x2a   : > { %s214_s6 = sshll.u32 %s206_s5, 4  ;;  %p1118_p5 = pnand %p757_p10, %p1095_p12  ;;  %s215_s6 = int_to_ptr.vmem [resolvable:$true] %s214_s6 }
  0x2b   : > { %s1125_s9 = scalar_lea.hbm %s1228_s1, %s689_s26  ;;  %s221_s12 = sand.u32 1, %s985_s20  }
  0x2c   : > { %s203_s29 = scalar_lea.sflag [#allocation4], %s202_s13  ;;  %p843_p7 = pneg %p1118_p5 }
  0x2d   : > { %s854_s27 = scalar_lea.vmem %s215_s6, 128  ;;  %s990_s10 = smov [#allocation3]  }
  0x2e   : > { %p855_p9 = scmp.ne.s32.totalorder %s215_s6, %s854_s27  ;;  %s859_s28 = sshll.u32 %s990_s10, 4  ;;  %s860_s28 = int_to_ptr.vmem [resolvable:$false] %s859_s28 }
  0x2f   : > { %s861_s5 = scalar_lea.vmem %s860_s28, 256  ;;  %p862_p12 = scmp.lt.s32.totalorder %s215_s6, %s860_s28 }
  0x30   : > { %p857_p2 = pnand %p855_p9, %p843_p7  ;;  %p863_p13 = scmp.lt.s32.totalorder %s861_s5, %s854_s27 }
  0x32   : > { %p858_p11 = pneg %p857_p2  ;;  %p864_p10 = por %p863_p13, %p862_p12 }
  0x34   : > { %p865_p3 = pnand %p864_p10, %p858_p11 }
  0x36   : > { %868 = shalt.err (!%p865_p3)
}
  0x37   : > { %748 = dma.hbm_to_vmem [thread:$0]  (!%p1118_p5), %s212_s30, 128, %s215_s6, %s203_s29  }
  0x38   : > { %s225_s2 = scalar_lea.vmem [#allocation6], %s688_s14  ;;  %s222_s26 = scalar_lea.sflag [#allocation7], %s221_s12 }
  0x39   : > { %s233_s13 = sshll.u32 %s225_s2, 4  ;;  %s991_s10 = smov [#allocation6]   ;;  %s234_s13 = int_to_ptr.vmem [resolvable:$true] %s233_s13 }
  0x3a   : > { %s882_s8 = scalar_lea.vmem %s234_s13, 128  ;;  %s887_s28 = sshll.u32 %s991_s10, 4  ;;  %s888_s28 = int_to_ptr.vmem [resolvable:$false] %s887_s28 }
  0x3b   : > { %p883_p9 = scmp.ne.s32.totalorder %s234_s13, %s882_s8  ;;  %s889_s27 = scalar_lea.vmem %s888_s28, 256 }
  0x3c   : > { %p890_p11 = scmp.lt.s32.totalorder %s234_s13, %s888_s28  ;;  %p891_p12 = scmp.lt.s32.totalorder %s889_s27, %s882_s8 }
  0x3d   : > { %p885_p2 = pnand %p883_p9, %p843_p7 }
  0x3e   : > { %p892_p13 = por %p891_p12, %p890_p11 }
  0x3f   : > { %p886_p1 = pneg %p885_p2 }
  0x41   : > { %p893_p10 = pnand %p892_p13, %p886_p1 }
  0x43   : > { %896 = shalt.err (!%p893_p10)
}
  0x44   : > { %751 = dma.hbm_to_vmem [thread:$0]  (!%p1118_p5), %s1125_s9, 128, %s234_s13, %s222_s26  }
  0x45   : > { %242 = sbr.rel (%p1069_p8) target bundleno = 346 (0x15a), region = 36  ;;  %s1144_s29 = sand.u32 (!%p1069_p8), 1, %s969_s16  }
  0x46   : > { %s1147_s14 = sshll.u32 (!%p1069_p8), %s1144_s29, 3  ;;  %s245_s30 = scalar_lea.sflag (!%p1069_p8), [#allocation4], %s1144_s29 }
  0x47   : > { %s248_s6 = scalar_lea.vmem (!%p1069_p8), [#allocation3], %s1147_s14 }
  0x4a   : > { %948 = dma.done.wait (%p1059_p4), %s245_s30, 128  }
  0x4b   : > { %950 = vsyncadd (%p1059_p4), %s245_s30, 4294967168  ;;  %s253_s25 = sand.u32 1, %s1050_s21   ;;  %s257_s9 = scalar_lea.vmem [#allocation6], %s1147_s14 }
  0x4c   : > { %s254_s7 = scalar_lea.sflag [#allocation7], %s253_s25 }
  0x4d   : > { %952 = dma.done.wait (%p1059_p4), %s254_s7, 128  }
  0x4e   : > { %954 = vsyncadd (%p1059_p4), %s254_s7, 4294967168  ;;  %p1245_p1 = scmp.eq.s32.totalorder %s1050_s21, 0 }
  0x50   : > { %956 = dma.done.wait (%p1245_p1), [#allocation7], 256   ;;  %p1246_p8 = pmov %p1245_p1 }
  0x51   : > { %v299_v0 = vlaneseq  ;;  %v992_v1 = vmov 1966171168   ;;  %v812_v6 = vld [vmem:[#allocation8 + $0x8] sm:$0xff]   ;;  %v813_v7 = vld [vmem:[#allocation8] sm:$0xff]   ;;  %v293_v15 = vld [vmem:[%s257_s9] sm:$0xff]  ;;  %vm427_vm0 = vcmask 261120  }
  0x52   : > { %958 = vsyncadd (%p1246_p8), [#allocation7], 4294967040  ;;  %v297_v2 = vunpack.c.l.s4 %v992_v1  ;;  %715 = vmatprep.subr.bf16.mxu0 %v812_v6  ;;  %727 = vmatprep.subr.bf16.mxu1 %v812_v6  ;;  %v292_v8 = vld [vmem:[%s248_s6] sm:$0xff]  ;;  %v697_v53 = vld [vmem:[%s1230_s3] ss:$0 sm:$0xff]  ;;  %vm505_vm1 = vcmask 523264  }
  0x53   : > { %v300_v3 = vshrl.u32 %v299_v0, 7  ;;  %716 = vmatpush3.bf16.msra.mxu0 %v812_v6  ;;  %729 = vmatpush3.bf16.msra.mxu1 %v812_v6  ;;  %v295_v11 = vcombine.high %v292_v8, %v292_v8  ;;  %vm531_vm2 = vcmask 516096   ;;  %s706_s12 = sshll.u32 %s977_s18, 7  ;;  %s290_s5 = scalar_lea.vmem [#allocation9], %s1147_s14 }
  0x54   : > { %v298_v4 = vunpack.c.0.s8 %v297_v2  ;;  %717 = vmatprep.subr.bf16.mxu0 %v813_v7  ;;  %728 = vmatprep.subr.bf16.mxu1 %v813_v7  ;;  %s567_s2 = sshll.u32 %s290_s5, 4  ;;  %s1185_s8 = scalar_lea.hbm %s1231_s4, %s706_s12  ;;  %s568_s2 = int_to_ptr.vmem [resolvable:$true] %s567_s2 }
  0x55   : > { %v346_v10 = vsub.s32 0, %v300_v3  ;;  %s553_s10 = scalar_lea.sflag [#allocation5], %s1144_s29  ;;  %s897_s28 = scalar_lea.vmem %s568_s2, 128 }
  0x56   : > { %v301_v5 = vsub.s32 %v298_v4, %v300_v3  ;;  %p898_p4 = scmp.ne.s32.totalorder %s568_s2, %s897_s28  ;;  %s993_s27 = smov [#allocation9]  }
  0x57   : > { %718 = vmatpush3.bf16.msra.mxu0 %v813_v7  ;;  %730 = vmatpush3.bf16.msra.mxu1 %v813_v7  ;;  %s901_s30 = sshll.u32 %s993_s27, 4  ;;  %s902_s30 = int_to_ptr.vmem [resolvable:$false] %s901_s30 }
  0x58   : > { %v302_v9 = vrot.slane %v292_v8, %v301_v5  ;;  %v309_v14 = vrot.slane %v295_v11, %v301_v5  ;;  %p899_p5 = pnand %p898_p4, %p1101_p0  ;;  %s903_s18 = scalar_lea.vmem %s902_s30, 256 }
  0x59   : > { %p904_p3 = scmp.lt.s32.totalorder %s568_s2, %s902_s30  ;;  %p905_p9 = scmp.lt.s32.totalorder %s903_s18, %s897_s28 }
  0x5a   : > { %v310_v12 = vcombine.high %v302_v9, %v302_v9  ;;  %v318_v13 = vrot.slane %v302_v9, %v301_v5  ;;  %v311_v19 = vcombine.high %v309_v14, %v309_v14  ;;  %v325_v20 = vrot.slane %v309_v14, %v301_v5  ;;  %p900_p7 = pneg %p899_p5 }
  0x5b   : > { %p906_p2 = por %p905_p9, %p904_p3 }
  0x5c   : > { %v332_v16 = vrot.slane %v310_v12, %v301_v5  ;;  %v340_v17 = vcombine.high %v318_v13, %v318_v13  ;;  %v347_v18 = vrot.slane %v318_v13, %v346_v10  ;;  %v339_v25 = vrot.slane %v311_v19, %v301_v5 }
  0x5d   : > { %v341_v26 = vcombine.high %v325_v20, %v325_v20  ;;  %v363_v27 = vrot.slane %v325_v20, %v346_v10  ;;  %p907_p11 = pnand %p906_p2, %p900_p7 }
  0x5e   : > { %v342_v21 = vcombine.high %v332_v16, %v332_v16  ;;  %v351_v22 = vrot.slane %v332_v16, %v346_v10  ;;  %v384_v23 = vadd.f32 %v347_v18, %v293_v15  ;;  %v355_v24 = vrot.slane %v340_v17, %v346_v10 }
  0x5f   : > { %v343_v32 = vcombine.high %v339_v25, %v339_v25  ;;  %v367_v33 = vrot.slane %v339_v25, %v346_v10  ;;  %v388_v34 = vadd.f32 %v363_v27, %v293_v15  ;;  %v371_v35 = vrot.slane %v341_v26, %v346_v10 }
  0x60   : > { %v385_v28 = vadd.f32 %v351_v22, %v293_v15  ;;  %v392_v29 = vmax.f32 %v384_v23, 0.0  ;;  %v359_v30 = vrot.slane %v342_v21, %v346_v10  ;;  %v386_v31 = vadd.f32 %v355_v24, %v293_v15 }
  0x61   : > { %v389_v39 = vadd.f32 %v367_v33, %v293_v15  ;;  %v396_v40 = vmax.f32 %v388_v34, 0.0  ;;  %v375_v41 = vrot.slane %v343_v32, %v346_v10  ;;  %v390_v42 = vadd.f32 %v371_v35, %v293_v15 }
  0x62   : > { %v393_v36 = vmax.f32 %v385_v28, 0.0  ;;  %v387_v37 = vadd.f32 %v359_v30, %v293_v15  ;;  %v394_v38 = vmax.f32 %v386_v31, 0.0 }
  0x63   : > { %v397_v45 = vmax.f32 %v389_v39, 0.0  ;;  %v391_v46 = vadd.f32 %v375_v41, %v293_v15  ;;  %v398_v47 = vmax.f32 %v390_v42, 0.0 }
  0x64   : > { %v400_v43 = vpack.c.bf16 %v393_v36, %v392_v29  ;;  %v395_v44 = vmax.f32 %v387_v37, 0.0 }
  0x65   : > { %v402_v49 = vpack.c.bf16 %v397_v45, %v396_v40  ;;  %v399_v50 = vmax.f32 %v391_v46, 0.0 }
  0x66   : > { %719 = vmatprep.mubr.msk.bf16.mxu0 %vm427_vm0, %v400_v43  ;;  %v401_v48 = vpack.c.bf16 %v395_v44, %v394_v38 }
  0x67   : > { %723 = vmatprep.mubr.msk.bf16.mxu1 %vm427_vm0, %v402_v49  ;;  %v403_v51 = vpack.c.bf16 %v399_v50, %v398_v47 }
  0x68   : > { %720 = vmatmul.mubr.msk.bf16.vlgmr.msra.gmra.mxu0 %vm427_vm0, %v401_v48 }
  0x69   : > { %724 = vmatmul.mubr.msk.bf16.vlgmr.msra.gmra.mxu1 %vm427_vm0, %v403_v51 }
 0x128   : > { %v721_v52 = vpop.f32.mrf.mxu0 }
 0x129   : > { %v725_v55 = vpop.f32.mrf.mxu1  ;;  %v483_v57 = vadd.f32 %v721_v52, %v697_v53 }
 0x12a   : > { %v474_v54 = vpop.f32.mrf.mxu0  ;;  %v499_v58 = vadd.f32 %v725_v55, %v697_v53 }
 0x12b   : > { %v490_v59 = vpop.f32.mrf.mxu1  ;;  %v475_v0 = vadd.f32 %v697_v53, %v474_v54  ;;  %v508_v3 = vsel %vm505_vm1, %v483_v57, -inf }
 0x12c   : > { %v722_v56 = vpop.f32.mrf.mxu0  ;;  %v491_v61 = vadd.f32 %v697_v53, %v490_v59  ;;  %v514_v4 = vsel %vm505_vm1, %v499_v58, -inf }
 0x12d   : > { %v486_v60 = vadd.f32 %v722_v56, %v697_v53  ;;  %v726_v63 = vpop.f32.mrf.mxu1  ;;  %v506_v11 = vsel %vm505_vm1, %v475_v0, -inf  ;;  %v515_v14 = vmax.f32 %v508_v3, %v514_v4 }
 0x12e   : > { %v477_v62 = vpop.f32.mrf.mxu0  ;;  %v502_v2 = vadd.f32 %v726_v63, %v697_v53  ;;  %v510_v7 = vsel %vm505_vm1, %v491_v61, -inf }
 0x12f   : > { %v478_v1 = vadd.f32 %v697_v53, %v477_v62  ;;  %v493_v5 = vpop.f32.mrf.mxu1  ;;  %v509_v6 = vsel %vm505_vm1, %v486_v60, -inf  ;;  %v511_v15 = vmax.f32 %v506_v11, %v510_v7 }
 0x130   : > { %v516_v8 = vsel %vm505_vm1, %v502_v2, -inf  ;;  %v494_v9 = vadd.f32 %v697_v53, %v493_v5 }
 0x131   : > { %v517_v10 = vmax.f32 %v509_v6, %v516_v8  ;;  %v507_v12 = vsel %vm505_vm1, %v478_v1, -inf }
 0x132   : > { %v512_v13 = vsel %vm505_vm1, %v494_v9, -inf }
 0x133   : > { %v513_v16 = vmax.f32 %v507_v12, %v512_v13  ;;  %v519_v17 = vmax.f32 %v515_v14, %v517_v10 }
 0x135   : > { %v518_v18 = vmax.f32 %v511_v15, %v513_v16 }
 0x137   : > { %v520_v19 = vmax.f32 %v518_v18, %v519_v17 }
 0x139   : > { %v521_v20 = vrot.slane %v520_v19, 4 }
 0x13b   : > { %v522_v21 = vmax.f32 %v520_v19, %v521_v20 }
 0x13d   : > { %v523_v22 = vrot.slane %v522_v21, 2 }
 0x13f   : > { %v524_v23 = vmax.f32 %v522_v21, %v523_v22 }
 0x141   : > { %v525_v24 = vrot.slane %v524_v23, 1 }
 0x143   : > { %v526_v25 = vmax.f32 %v524_v23, %v525_v24 }
 0x145   : > { %532 = vst.msk [vmem:[#allocation2] sm:$0x1] %vm531_vm2, %v526_v25 }
 0x14c   : > { %v704_v26 = vld [vmem:[#allocation2] ss:$0 sm:$0xff] }
 0x14d   : > { %551 = vst.msk [vmem:[%s290_s5] sm:$0xff] %vm505_vm1, %v704_v26 }
 0x14e   : > { %910 = shalt.err (!%p907_p11)
}
 0x14f   : > { %s911_s14 = scalar_lea.hbm %s1185_s8, 128  ;;  %s915_s25 = scalar_lea.hbm %s1231_s4, 512 }
 0x150   : > { %p912_p12 = scmp.ne.s32.totalorder %s1185_s8, %s911_s14  ;;  %p916_p1 = scmp.lt.s32.totalorder %s1185_s8, %s1231_s4 }
 0x151   : > { %p917_p8 = scmp.lt.s32.totalorder %s915_s25, %s911_s14 }
 0x152   : > { %p913_p13 = pnand %p912_p12, %p1101_p0 }
 0x153   : > { %p918_p4 = por %p917_p8, %p916_p1 }
 0x154   : > { %p914_p10 = pneg %p913_p13 }
 0x156   : > { %p919_p5 = pnand %p918_p4, %p914_p10 }
 0x158   : > { %922 = shalt.err (!%p919_p5)
}
 0x159   : > { %739 = dma.vmem_to_hbm [thread:$0]  (%p1101_p0), %s568_s2, 128, %s1185_s8, %s553_s10  }
 0x15a PF: > { %p759_p7 = scmp.ge.s32.totalorder %s985_s20, 2  ;;  %s579_s21 = sand.u32 1, %s965_s15  }
 0x15b   : > { %s580_s23 = scalar_lea.sflag [#allocation5], %s579_s21 }
 0x15c   : > { %p753_p3 = pnand %p759_p7, %p1064_p6 }
 0x15e   : > { %p754_p9 = pneg %p753_p3 }
 0x160   : > { %960 = dma.done.wait (%p754_p9), %s580_s23, 128  }
 0x161   : > { %962 = vsyncadd (%p754_p9), %s580_s23, 4294967168  ;;  %s23_s20 = sadd.s32 1, %s985_s20   ;;  %s1247_s11 = sld [smem:[#allocation14_spill]] }
 0x162   : > { %p20_p2 = scmp.ge.s32.totalorder %s23_s20, 6   ;;  %s1248_s15 = smov %s969_s16 }
 0x163   : > { %s1249_s16 = smov %s973_s17  ;;  %s1250_s17 = smov %s1110_s22 }
 0x164   : > { %s1251_s18 = smov %s981_s19  ;;  %22 = sbr.rel (!%p20_p2) target bundleno = 10 (0xa), region = 110 }
 0x167   : > { %s1252_s19 = smov %s1247_s11 }
 0x169   :  { %585 = vsyncpa [#allocation4], 1 }
 0x16a   :  { %587 = vsyncpa [#allocation4 + $0x1], 1 }
 0x16b   :  { %588 = vsyncpa [#allocation7], 1 }
 0x16c   :  { %590 = vsyncpa [#allocation7 + $0x1], 1 }
 0x16d   :  { %591 = vsyncpa [#allocation5], 1 }
 0x16e   :  { %593 = vsyncpa [#allocation5 + $0x1], 1 }

</bundles_post_ra>
